<compile_context>
chip_gen: v7x
topology: tpu7x:2x2x1
jax: 0.10.0
libtpu: 0.0.40
codegen_flags: <defaults>
</compile_context>

<pallas_src>
import random

import jax
import jax.numpy as jnp
from jax.experimental import pallas as pl
from jax.experimental.pallas import tpu as pltpu


# ---------------- module "hyper-parameters" (from __init__) -----------------
FREQ_MASKS = 2
TIME_MASKS = 2
FREQ_WIDTH = 10          # int -> non-adaptive
TIME_WIDTH = 10          # int -> non-adaptive
MASK_VALUE = 0.0


def _pick_time_tile(T_dim: int, max_time_tile: int = 2048) -> int:
    """Largest 128-multiple divisor of T up to max_time_tile (or full T)."""
    if T_dim % 128 != 0:
        return T_dim                       # full-dim block is always legal
    t_tile = min(T_dim, max(128, (max_time_tile // 128) * 128))
    while T_dim % t_tile != 0:
        t_tile -= 128
    return t_tile


def _make_specaug_kernel(freq_masks: int, time_masks: int, mask_value: float,
                         stride: int, t_tile: int):
    """Kernel over a squeezed (F, tT) tile of one batch element."""

    def kernel(params_ref, x_ref, o_ref):
        b = pl.program_id(0)           # batch element
        tj = pl.program_id(1)          # time tile index
        f_dim, t_blk = x_ref.shape     # 2D after squeezing the batch dim

        base = b * stride              # scalar offset into the flat params

        # Separable index vectors: (F, 1) and (1, tT).  The time iota carries
        # the global offset of this time tile.
        fidx = jax.lax.broadcasted_iota(jnp.int32, (f_dim, 1), 0)
        tidx = jax.lax.broadcasted_iota(jnp.int32, (1, t_blk), 1) + tj * t_tile

        # Frequency masks: union of [s, s+w) row stripes -> (F, 1) bool.
        fmask = jnp.zeros((f_dim, 1), dtype=jnp.bool_)
        for m in range(freq_masks):
            s = params_ref[base + m]
            e = s + params_ref[base + freq_masks + m]
            fmask = fmask | ((fidx >= s) & (fidx < e))

        # Time masks: union of [s, s+w) column stripes -> (1, tT) bool.
        t_base = 2 * freq_masks
        tmask = jnp.zeros((1, t_blk), dtype=jnp.bool_)
        for m in range(time_masks):
            s = params_ref[base + t_base + m]
            e = s + params_ref[base + t_base + time_masks + m]
            tmask = tmask | ((tidx >= s) & (tidx < e))

        x = x_ref[...]
        mv = jnp.asarray(mask_value, x.dtype)
        # Single broadcasted OR + single select over the full tile.
        o_ref[...] = jnp.where(fmask | tmask, mv, x)

    return kernel


def spec_augment_pallas(input_spec, length, mask_params,
                        *, freq_masks=FREQ_MASKS, time_masks=TIME_MASKS,
                        mask_value=MASK_VALUE, max_time_tile=2048):
    """Apply SpecAugment masks. Returns (masked_spec, length)."""
    B, F_dim, T_dim = input_spec.shape
    stride = 2 * (freq_masks + time_masks)
    if stride == 0:
        return input_spec, length

    t_tile = _pick_time_tile(T_dim, max_time_tile)
    grid = (B, T_dim // t_tile)
    kernel = _make_specaug_kernel(freq_masks, time_masks, mask_value,
                                  stride, t_tile)

    out = pl.pallas_call(
        kernel,
        out_shape=jax.ShapeDtypeStruct((B, F_dim, T_dim), input_spec.dtype),
        grid_spec=pltpu.PrefetchScalarGridSpec(
            num_scalar_prefetch=1,
            grid=grid,
            in_specs=[
                # Leading batch dim squeezed -> kernel sees a 2D (F, tT) ref.
                pl.BlockSpec((None, F_dim, t_tile),
                             lambda b, tj, params: (b, 0, tj)),
            ],
            out_specs=pl.BlockSpec((None, F_dim, t_tile),
                                   lambda b, tj, params: (b, 0, tj)),
        ),
        compiler_params=pltpu.CompilerParams(
            dimension_semantics=("parallel", "parallel")),
        # Alias spectrogram input (arg 1; arg 0 is the scalar prefetch) to the
        # output so no second B*F*T HBM buffer is allocated.
        input_output_aliases={1: 0},
    )(mask_params, input_spec)
    return out, length


def draw_mask_params(rng, B, F_dim, lengths,
                     freq_masks=FREQ_MASKS, time_masks=TIME_MASKS,
                     freq_width=FREQ_WIDTH, time_width=TIME_WIDTH):
    """Host-side replication of the PyTorch module's RNG draws.

    Returns one flat int32 array of shape (B * 2 * (freq_masks + time_masks),)
    laid out per-batch as [f_starts..., f_widths..., t_starts..., t_widths...].
    """
    adaptive = isinstance(time_width, float)
    params = []
    for idx in range(B):
        f_start, f_w, t_start, t_w = [], [], [], []
        for _ in range(freq_masks):
            f_start.append(rng.randint(0, F_dim - freq_width))
            f_w.append(rng.randint(0, freq_width))
        for _ in range(time_masks):
            tw = max(1, int(lengths[idx] * time_width)) if adaptive else time_width
            t_start.append(rng.randint(0, max(1, int(lengths[idx]) - tw)))
            t_w.append(rng.randint(0, tw))
        params.extend(f_start + f_w + t_start + t_w)
    return jnp.asarray(params, dtype=jnp.int32)


if __name__ == "__main__":
    B, F_dim, T_dim = 2, 16, 256

    key = jax.random.PRNGKey(0)
    input_spec = jax.random.normal(key, (B, F_dim, T_dim), dtype=jnp.float32)
    length = jnp.asarray([T_dim, T_dim - 64], dtype=jnp.int32)

    # Deterministic host-side RNG for mask positions (mirrors random.Random).
    host_rng = random.Random(0)
    mask_params = draw_mask_params(host_rng, B, F_dim,
                                   [int(v) for v in length])

    # Reference (computed BEFORE the kernel call: the input is aliased/donated
    # to the kernel output).
    stride = 2 * (FREQ_MASKS + TIME_MASKS)
    params_host = [int(v) for v in mask_params]
    ref = input_spec
    for b in range(B):
        row = ref[b]
        base = b * stride
        for m in range(FREQ_MASKS):
            s = params_host[base + m]
            w = params_host[base + FREQ_MASKS + m]
            row = row.at[s:s + w, :].set(MASK_VALUE)
        for m in range(TIME_MASKS):
            s = params_host[base + 2 * FREQ_MASKS + m]
            w = params_host[base + 2 * FREQ_MASKS + TIME_MASKS + m]
            row = row.at[:, s:s + w].set(MASK_VALUE)
        ref = ref.at[b].set(row)
    ref = jax.block_until_ready(ref)

    # Run the Pallas kernel.  Use a 128-wide time tile here so the demo
    # exercises the (B, T//tT) grid and the global time-offset logic.
    out_spec, out_len = spec_augment_pallas(
        input_spec, length, mask_params, max_time_tile=128)
    jax.block_until_ready(out_spec)
    jax.block_until_ready(out_len)

    assert jnp.allclose(out_spec, ref), "mismatch vs reference"
    assert jnp.array_equal(out_len, length)
    print("KERNEL_OK")
</pallas_src>

<mosaic_0001>
module attributes {stable_mosaic.version = 11 : i64} {
  func.func @kernel(%arg0: i32, %arg1: i32, %arg2: memref<16xi32, #tpu.memory_space<smem>>, %arg3: memref<1x16x128xf32, #tpu.memory_space<vmem>>, %arg4: memref<1x16x128xf32, #tpu.memory_space<vmem>>) attributes {dimension_semantics = [#tpu.dimension_semantics<parallel>, #tpu.dimension_semantics<parallel>], iteration_bounds = array<i64: 2, 2>, scalar_prefetch = 1 : i64, scratch_operands = 0 : i64, tpu.core_type = #tpu.core_type<tc>, window_params = [{transform_indices = @transform_0, window_bounds = array<i64: 1, 16, 128>}, {transform_indices = @transform_1, window_bounds = array<i64: 1, 16, 128>}]} {
    %c8_i32 = arith.constant 8 : i32
    %0 = arith.muli %arg0, %c8_i32 : i32
    %1 = tpu.iota {dimensions = array<i32: 0>} : vector<16x1xi32>
    %2 = tpu.iota {dimensions = array<i32: 1>} : vector<1x128xi32>
    %c128_i32 = arith.constant 128 : i32
    %3 = arith.muli %arg1, %c128_i32 : i32
    %4 = vector.broadcast %3 : i32 to vector<1x128xi32>
    %5 = arith.addi %2, %4 : vector<1x128xi32>
    %false = arith.constant false
    %6 = vector.broadcast %false : i1 to vector<16x1xi1>
    %c0_i32 = arith.constant 0 : i32
    %7 = arith.addi %0, %c0_i32 : i32
    %8 = arith.index_cast %7 : i32 to index
    %9 = memref.load %arg2[%8] : memref<16xi32, #tpu.memory_space<smem>>
    %c2_i32 = arith.constant 2 : i32
    %10 = arith.addi %0, %c2_i32 : i32
    %c0_i32_0 = arith.constant 0 : i32
    %11 = arith.addi %10, %c0_i32_0 : i32
    %12 = arith.index_cast %11 : i32 to index
    %13 = memref.load %arg2[%12] : memref<16xi32, #tpu.memory_space<smem>>
    %14 = arith.addi %9, %13 : i32
    %15 = vector.broadcast %9 : i32 to vector<16x1xi32>
    %16 = arith.cmpi sge, %1, %15 : vector<16x1xi32>
    %17 = vector.broadcast %14 : i32 to vector<16x1xi32>
    %18 = arith.cmpi slt, %1, %17 : vector<16x1xi32>
    %19 = arith.andi %16, %18 : vector<16x1xi1>
    %20 = arith.ori %6, %19 : vector<16x1xi1>
    %c1_i32 = arith.constant 1 : i32
    %21 = arith.addi %0, %c1_i32 : i32
    %22 = arith.index_cast %21 : i32 to index
    %23 = memref.load %arg2[%22] : memref<16xi32, #tpu.memory_space<smem>>
    %c2_i32_1 = arith.constant 2 : i32
    %24 = arith.addi %0, %c2_i32_1 : i32
    %c1_i32_2 = arith.constant 1 : i32
    %25 = arith.addi %24, %c1_i32_2 : i32
    %26 = arith.index_cast %25 : i32 to index
    %27 = memref.load %arg2[%26] : memref<16xi32, #tpu.memory_space<smem>>
    %28 = arith.addi %23, %27 : i32
    %29 = vector.broadcast %23 : i32 to vector<16x1xi32>
    %30 = arith.cmpi sge, %1, %29 : vector<16x1xi32>
    %31 = vector.broadcast %28 : i32 to vector<16x1xi32>
    %32 = arith.cmpi slt, %1, %31 : vector<16x1xi32>
    %33 = arith.andi %30, %32 : vector<16x1xi1>
    %34 = arith.ori %20, %33 : vector<16x1xi1>
    %false_3 = arith.constant false
    %35 = vector.broadcast %false_3 : i1 to vector<1x128xi1>
    %c4_i32 = arith.constant 4 : i32
    %36 = arith.addi %0, %c4_i32 : i32
    %c0_i32_4 = arith.constant 0 : i32
    %37 = arith.addi %36, %c0_i32_4 : i32
    %38 = arith.index_cast %37 : i32 to index
    %39 = memref.load %arg2[%38] : memref<16xi32, #tpu.memory_space<smem>>
    %c4_i32_5 = arith.constant 4 : i32
    %40 = arith.addi %0, %c4_i32_5 : i32
    %c2_i32_6 = arith.constant 2 : i32
    %41 = arith.addi %40, %c2_i32_6 : i32
    %c0_i32_7 = arith.constant 0 : i32
    %42 = arith.addi %41, %c0_i32_7 : i32
    %43 = arith.index_cast %42 : i32 to index
    %44 = memref.load %arg2[%43] : memref<16xi32, #tpu.memory_space<smem>>
    %45 = arith.addi %39, %44 : i32
    %46 = vector.broadcast %39 : i32 to vector<1x128xi32>
    %47 = arith.cmpi sge, %5, %46 : vector<1x128xi32>
    %48 = vector.broadcast %45 : i32 to vector<1x128xi32>
    %49 = arith.cmpi slt, %5, %48 : vector<1x128xi32>
    %50 = arith.andi %47, %49 : vector<1x128xi1>
    %51 = arith.ori %35, %50 : vector<1x128xi1>
    %c4_i32_8 = arith.constant 4 : i32
    %52 = arith.addi %0, %c4_i32_8 : i32
    %c1_i32_9 = arith.constant 1 : i32
    %53 = arith.addi %52, %c1_i32_9 : i32
    %54 = arith.index_cast %53 : i32 to index
    %55 = memref.load %arg2[%54] : memref<16xi32, #tpu.memory_space<smem>>
    %c4_i32_10 = arith.constant 4 : i32
    %56 = arith.addi %0, %c4_i32_10 : i32
    %c2_i32_11 = arith.constant 2 : i32
    %57 = arith.addi %56, %c2_i32_11 : i32
    %c1_i32_12 = arith.constant 1 : i32
    %58 = arith.addi %57, %c1_i32_12 : i32
    %59 = arith.index_cast %58 : i32 to index
    %60 = memref.load %arg2[%59] : memref<16xi32, #tpu.memory_space<smem>>
    %61 = arith.addi %55, %60 : i32
    %62 = vector.broadcast %55 : i32 to vector<1x128xi32>
    %63 = arith.cmpi sge, %5, %62 : vector<1x128xi32>
    %64 = vector.broadcast %61 : i32 to vector<1x128xi32>
    %65 = arith.cmpi slt, %5, %64 : vector<1x128xi32>
    %66 = arith.andi %63, %65 : vector<1x128xi1>
    %67 = arith.ori %51, %66 : vector<1x128xi1>
    %c0 = arith.constant 0 : index
    %c0_13 = arith.constant 0 : index
    %c0_14 = arith.constant 0 : index
    %68 = vector.load %arg3[%c0, %c0_13, %c0_14] : memref<1x16x128xf32, #tpu.memory_space<vmem>>, vector<1x16x128xf32>
    %69 = vector.shape_cast %68 : vector<1x16x128xf32> to vector<16x128xf32>
    %70 = vector.broadcast %34 : vector<16x1xi1> to vector<16x128xi1>
    %71 = vector.broadcast %67 : vector<1x128xi1> to vector<16x128xi1>
    %72 = arith.ori %70, %71 : vector<16x128xi1>
    %cst = arith.constant 0.000000e+00 : f32
    %73 = vector.broadcast %cst : f32 to vector<16x128xf32>
    %74 = arith.select %72, %73, %69 : vector<16x128xi1>, vector<16x128xf32>
    %c0_15 = arith.constant 0 : index
    %c0_16 = arith.constant 0 : index
    %c0_17 = arith.constant 0 : index
    %75 = vector.load %arg4[%c0_15, %c0_16, %c0_17] : memref<1x16x128xf32, #tpu.memory_space<vmem>>, vector<1x16x128xf32>
    %76 = vector.shape_cast %75 : vector<1x16x128xf32> to vector<16x128xf32>
    %77 = vector.shape_cast %74 : vector<16x128xf32> to vector<1x16x128xf32>
    tpu.vector_store %arg4[%c0_15, %c0_16, %c0_17], %77 {strides = array<i32>} : memref<1x16x128xf32, #tpu.memory_space<vmem>>, vector<1x16x128xf32>,
    return
  }
  func.func @transform_0(%arg0: i32, %arg1: i32, %arg2: memref<16xi32, #tpu.memory_space<smem>>) -> (i32, i32, i32) {
    %c0_i32 = arith.constant 0 : i32
    %c0_i32_0 = arith.constant 0 : i32
    return %arg0, %c0_i32, %arg1 : i32, i32, i32
  }
  func.func @transform_1(%arg0: i32, %arg1: i32, %arg2: memref<16xi32, #tpu.memory_space<smem>>) -> (i32, i32, i32) {
    %c0_i32 = arith.constant 0 : i32
    %c0_i32_0 = arith.constant 0 : i32
    return %arg0, %c0_i32, %arg1 : i32, i32, i32
  }
}

</mosaic_0001>

<bundles_post_ra>
// kernel: tpu_custom_call.1
= control target key start
LH: loop header
LB: loop body
LE: loop exit
PB: predicated region body
PF: predicated region fallthrough
CT: control target
= control target key end

     0   :  { %s852_s0 = inlined_call_operand.vmem [shape: s32[16], index: 0, kind: input, shape index: {}]   ;;  %s853_s1 = inlined_call_operand.hbm [shape: f32[2,16,256], index: 1, kind: input, shape index: {}, may-alias: {1,2}]   ;;  %s854_s2 = inlined_call_operand.hbm [shape: f32[2,16,256], index: 2, kind: output, shape index: {}, may-alias: {1,2}]  }
   0x1   :  { %857 = sst [smem:[#allocation11_spill]] %s853_s1  ;;  %s7_s11 = sshll.u32 %s852_s0, 4  ;;  %s8_s11 = int_to_ptr.vmem [resolvable:$true] %s7_s11 }
   0x2   :  { %s435_s12 = scalar_lea.vmem %s8_s11, 16  ;;  %p440_p1 = scmp.lt.s32.totalorder %s8_s11, %s8_s11 }
   0x3   :  { %p436_p0 = scmp.ne.s32.totalorder %s8_s11, %s435_s12  ;;  %p441_p2 = scmp.lt.s32.totalorder %s435_s12, %s435_s12 }
   0x5   :  { %p442_p3 = por %p441_p2, %p440_p1 }
   0x7   :  { %p443_p4 = pnand %p442_p3, %p436_p0 }
   0x9   :  { %446 = shalt.err (!%p443_p4)  }
   0xa   :  { %s579_s13 = smov [#allocation3]  }
   0xb   :  { %10 = dma.vmem_to_smem %s8_s11, 16, %s579_s13, [#allocation2] }
   0xc   :  { %537 = dma.done.wait [#allocation2], 16 }
   0xd   :  { %538 = vsyncadd [#allocation2], 4294967280 }
   0xe   :  { %12 = sfence }
   0xf   :  { %13 = vsyncpa [#allocation5], 0 }
  0x10   :  { %15 = vsyncpa [#allocation5 + $0x1], 0 }
  0x11   :  { %16 = vsyncpa [#allocation6], 0 }
  0x12   :  { %18 = vsyncpa [#allocation6 + $0x1], 0  ;;  %s606_s14 = smov 0   ;;  %s608_s0 = smov 0  }
  0x13   :  { %s610_s15 = smov 0   ;;  %s612_s16 = smov 0  }
  0x14   :  { %s614_s17 = smov 0   ;;  %s616_s18 = smov 0  }
  0x15   :  { %s618_s19 = smov 0   ;;  %s620_s20 = smov 0  }
  0x16 LB: > { %s333_s21 = sadd.s32 4294967295, %s577_s20   ;;  %s334_s22 = sadd.s32 4294967294, %s577_s20   ;;  %s577_s20 = sphi %s620_s20, %s24_s20   ;;  %s573_s19 = sphi %s618_s19, %s881_s19   ;;  %s569_s18 = sphi %s616_s18, %s880_s18   ;;  %s565_s17 = sphi %s614_s17, %s879_s17   ;;  %s561_s16 = sphi %s612_s16, %s878_s16   ;;  %s557_s15 = sphi %s610_s15, %s877_s15   ;;  %s553_s0 = sphi %s608_s0, %s876_s0   ;;  %s549_s14 = sphi %s606_s14, %s875_s14  }
  0x17   : > { %s33_s23 = sadd.s32 1, %s569_s18  ;;  %s36_s24 = sadd.s32 1, %s573_s19 }
  0x18   : > { %p34_p5 = scmp.ge.s32.totalorder %s33_s23, 2  ;;  %s45_s25 = sadd.s32 1, %s557_s15 }
  0x19   : > { %p52_p6 = scmp.ne.s32.totalorder %s557_s15, %s553_s0  ;;  %p53_p7 = scmp.eq.s32.totalorder %s577_s20, 0 }
  0x1a   : > { %s883_s23 = smov (%p34_p5, %s33_s23), 0  ;;  %s885_s24 = smov (!%p34_p5, %s36_s24), %s573_s19 }
  0x1b   : > { %s41_s26 = ssub.s32 %s569_s18, %s883_s23  ;;  %p659_p8 = por %p53_p7, %p52_p6 }
  0x1c   : > { %p38_p9 = scmp.ge.s32.totalorder %s885_s24, 2  ;;  %p58_p10 = scmp.ne.s32.totalorder %s553_s0, %s549_s14 }
  0x1d   : > { %p59_p11 = scmp.eq.s32.totalorder %s333_s21, 0  ;;  %p84_p12 = scmp.eq.s32.totalorder %s333_s21, 3 }
  0x1e   : > { %s887_s24 = smov (%p38_p9, %s885_s24), 0  ;;  %p90_p1 = scmp.eq.s32.totalorder %s334_s22, 3 }
  0x1f   : > { %p667_p13 = por %p59_p11, %p58_p10  ;;  %p671_p0 = por %p84_p12, %p52_p6 }
  0x20   : > { %s40_s30 = ssub.s32 %s573_s19, %s887_s24  ;;  %p677_p3 = por %p90_p1, %p58_p10 }
  0x21   : > { %s860_s29 = scalar_select %p671_p0, 1, 0 }
  0x22   : > { %s42_s3 = sor.u32 %s41_s26, %s40_s30  ;;  %p362_p4 = scmp.lt.s32.totalorder %s577_s20, 4 }
  0x23   : > { %p43_p2 = scmp.eq.s32.totalorder %s42_s3, 0  ;;  %s110_s5 = sand.u32 1, %s557_s15  }
  0x24   : > { %s861_s4 = scalar_select %p677_p3, 1, 0 }
  0x25   : > { %s684_s6 = scalar_select %p43_p2, %s557_s15, %s45_s25  }
  0x26   : > { %s337_s7 = sshll.u32 %s110_s5, 4  ;;  %s338_s8 = sshll.u32 %s573_s19, 2 }
  0x27   : > { %s119_s9 = sadd.s32 %s569_s18, %s338_s8  ;;  %s114_s10 = scalar_lea.vmem [#allocation4], %s337_s7 }
  0x28   : > { %s122_s11 = sshll.u32 %s114_s10, 4  ;;  %s339_s12 = sshll.u32 %s119_s9, 7  ;;  %s688_s11 = int_to_ptr.vmem [resolvable:$true] %s122_s11 }
  0x29   : > { %s862_s1 = sld [smem:[#allocation11_spill]]  ;;  %p697_p5 = pnand %p362_p4, %p659_p8 }
  0x2a   : > { %s701_s26 = scalar_lea.sflag [#allocation5], %s110_s5 }
  0x2b   : > { %p449_p7 = pneg %p697_p5 }
  0x2f   : > { %s693_s22 = scalar_lea.hbm %s862_s1, %s339_s12  ;;  %s452_s7 = scalar_lea.hbm %s862_s1, 1024 }
  0x30   : > { %s447_s30 = scalar_lea.hbm %s693_s22, 256  ;;  %p453_p8 = scmp.lt.u32.totalorder %s693_s22, %s862_s1 }
  0x31   : > { %p448_p6 = scmp.ne.s32.totalorder %s693_s22, %s447_s30  ;;  %p454_p11 = scmp.lt.u32.totalorder %s452_s7, %s447_s30 }
  0x32   : > { %p456_p1 = scmp.lt.u32.totalorder %s447_s30, %s693_s22 }
  0x33   : > { %p450_p9 = pnand %p449_p7, %p448_p6  ;;  %p455_p12 = por %p454_p11, %p453_p8 }
  0x35   : > { %p451_p10 = pneg %p450_p9  ;;  %p457_p2 = por %p456_p1, %p455_p12 }
  0x37   : > { %p458_p4 = pnand %p457_p2, %p451_p10 }
  0x39   : > { %461 = shalt.err (!%p458_p4)
}
  0x3a   : > { %s462_s5 = scalar_lea.vmem %s688_s11, 256  ;;  %s580_s10 = smov [#allocation4]  }
  0x3b   : > { %p463_p6 = scmp.ne.s32.totalorder %s688_s11, %s462_s5  ;;  %s467_s12 = sshll.u32 %s580_s10, 4  ;;  %s468_s12 = int_to_ptr.vmem [resolvable:$false] %s467_s12 }
  0x3c   : > { %s469_s13 = scalar_lea.vmem %s468_s12, 512  ;;  %p470_p0 = scmp.lt.s32.totalorder %s688_s11, %s468_s12 }
  0x3d   : > { %p465_p9 = pnand %p463_p6, %p449_p7  ;;  %p471_p8 = scmp.lt.s32.totalorder %s469_s13, %s462_s5 }
  0x3f   : > { %p466_p3 = pneg %p465_p9  ;;  %p472_p11 = por %p471_p8, %p470_p0 }
  0x41   : > { %p473_p12 = pnand %p472_p11, %p466_p3 }
  0x43   : > { %476 = shalt.err (!%p473_p12)
}
  0x44   : > { %s581_s21 = smov 256   ;;  %s582_s30 = smov 128  }
  0x45   : > { %s583_s27 = smov 8   ;;  %p340_p7 = scmp.ge.s32.totalorder %s577_s20, 1 }
  0x46   : > { %357 = dma.hbm_to_vmem [thread:$0]  (!%p697_p5), %s693_s22, 256, %s688_s11, %s701_s26, %s581_s21, %s582_s30, %s583_s27  }
  0x47   : > { %p130_p10 = scmp.lt.s32.totalorder %s577_s20, 5 }
  0x49   : > { %p131_p1 = pnand %p340_p7, %p130_p10 }
  0x4a   : > { %s732_s3 = sand.u32 (!%p131_p1), 1, %s553_s0  }
  0x4b   : > { %134 = sbr.rel (%p131_p1) target bundleno = 123 (0x7b), region = 24  ;;  %s856_s7 = sshll.u32 (!%p131_p1), %s732_s3, 4 }
  0x4c   : > { %s137_s8 = scalar_lea.sflag (!%p131_p1), [#allocation5], %s732_s3  ;;  %s738_s9 = scalar_lea.vmem (!%p131_p1), [#allocation4], %s856_s7 }
  0x52   : > { %540 = dma.done.wait (%p667_p13), %s137_s8, 256  }
  0x53   : > { %542 = vsyncadd (%p667_p13), %s137_s8, 4294967040  ;;  %s343_s11 = sshll.u32 %s565_s17, 3  ;;  %v160_v0 = vlaneseq  ;;  %s344_s22 = sshll.u32 %s561_s16, 7  ;;  %v216_v18 = vld [vmem:[%s738_s9] sm:$0xff]  ;;  %v217_v19 = vld [vmem:[%s738_s9 + $0x8] sm:$0xff] }
  0x54   : > { %s168_s25 = sld [smem:[#allocation3 + %s343_s11]]  ;;  %s169_s26 = sadd.s32 2, %s343_s11  ;;  %v166_v3 = vstv %s344_s22 }
  0x55   : > { %v161_v1 = vshrl.u32 %v160_v0, 7  ;;  %s180_s5 = sadd.s32 1, %s343_s11  ;;  %s170_s10 = sld [smem:[#allocation3 + %s169_s26]]  ;;  %v164_v2 = vand.u32 127, %v160_v0 }
  0x56   : > { %s746_s12 = sld [smem:[#allocation3 + %s180_s5]]  ;;  %s182_s13 = sadd.s32 3, %s343_s11 }
  0x57   : > { %s195_s21 = sadd.s32 4, %s343_s11  ;;  %s183_s30 = sld [smem:[#allocation3 + %s182_s13]]  ;;  %v162_v4 = vadd.s32 8, %v161_v1  ;;  %v167_v6 = vadd.s32 %v166_v3, %v164_v2 }
  0x58   : > { %s748_s27 = sld [smem:[#allocation3 + %s195_s21]]  ;;  %s197_s28 = sadd.s32 6, %s343_s11 }
  0x59   : > { %s205_s8 = sadd.s32 5, %s343_s11  ;;  %s198_s7 = sld [smem:[#allocation3 + %s197_s28]] }
  0x5a   : > { %v172_v5 = vstv %s168_s25  ;;  %s750_s1 = sld [smem:[#allocation3 + %s205_s8]]  ;;  %s207_s26 = sadd.s32 7, %s343_s11 }
  0x5b   : > { %s171_s5 = sadd.s32 %s170_s10, %s168_s25  ;;  %vm173_vm0 = vcmp.ge.s32.totalorder %v161_v1, %v172_v5  ;;  %s208_s13 = sld [smem:[#allocation3 + %s207_s26]]  ;;  %vm174_vm1 = vcmp.ge.s32.totalorder %v162_v4, %v172_v5 }
  0x5c   : > { %v185_v7 = vstv %s746_s12  ;;  %v175_v8 = vstv %s171_s5  ;;  %s346_s11 = sshll.u32 %s565_s17, 2  ;;  %s872_s10 = sshll.u32 %s732_s3, 4 }
  0x5d   : > { %vm176_vm2 = vcmp.lt.s32.totalorder %v161_v1, %v175_v8  ;;  %s184_s22 = sadd.s32 %s183_s30, %s746_s12  ;;  %vm186_vm3 = vcmp.ge.s32.totalorder %v161_v1, %v185_v7  ;;  %vm177_vm4 = vcmp.lt.s32.totalorder %v162_v4, %v175_v8  ;;  %vm187_vm10 = vcmp.ge.s32.totalorder %v162_v4, %v185_v7  ;;  %s158_s12 = scalar_lea.vmem [#allocation7], %s872_s10 }
  0x5e   : > { %v200_v9 = vstv %s748_s27  ;;  %vm755_vm5 = vmand %vm173_vm0, %vm176_vm2  ;;  %v188_v11 = vstv %s184_s22  ;;  %s245_s21 = sshll.u32 %s158_s12, 4  ;;  %s231_s28 = scalar_lea.sflag [#allocation6], %s732_s3  ;;  %s790_s21 = int_to_ptr.vmem [resolvable:$true] %s245_s21 }
  0x5f   : > { %vm189_vm6 = vcmp.lt.s32.totalorder %v161_v1, %v188_v11  ;;  %s199_s25 = sadd.s32 %s198_s7, %s748_s27  ;;  %vm201_vm7 = vcmp.ge.s32.totalorder %v167_v6, %v200_v9  ;;  %vm762_vm8 = vmand %vm174_vm1, %vm177_vm4  ;;  %vm190_vm11 = vcmp.lt.s32.totalorder %v162_v4, %v188_v11  ;;  %s242_s7 = sadd.s32 %s561_s16, %s346_s11 }
  0x60   : > { %v210_v12 = vstv %s750_s1  ;;  %vm766_vm9 = vmand %vm186_vm3, %vm189_vm6  ;;  %v202_v15 = vstv %s199_s25  ;;  %s347_s30 = sshll.u32 %s242_s7, 7  ;;  %s477_s8 = scalar_lea.vmem %s790_s21, 256 }
  0x61   : > { %vm193_vm12 = vmor %vm755_vm5, %vm766_vm9  ;;  %vm203_vm13 = vcmp.lt.s32.totalorder %v167_v6, %v202_v15  ;;  %s209_s17 = sadd.s32 %s208_s13, %s750_s1  ;;  %vm211_vm14 = vcmp.ge.s32.totalorder %v167_v6, %v210_v12  ;;  %s798_s27 = scalar_lea.hbm %s854_s2, %s347_s30 }
  0x62   : > { %vm776_vm15 = vmand %vm201_vm7, %vm203_vm13  ;;  %v212_v17 = vstv %s209_s17  ;;  %p478_p13 = scmp.ne.s32.totalorder %s790_s21, %s477_s8  ;;  %p873_p0 = scmp.ne.s32.totalorder %s860_s29, 0 }
  0x63   : > { %vm213_vm0 = vcmp.lt.s32.totalorder %v167_v6, %v212_v17  ;;  %vm192_vm1 = vmand %vm187_vm10, %vm190_vm11  ;;  %s584_s9 = smov [#allocation7]  }
  0x64   : > { %vm214_vm2 = vmand %vm211_vm14, %vm213_vm0  ;;  %p479_p3 = pnand %p478_p13, %p873_p0  ;;  %s481_s26 = sshll.u32 %s584_s9, 4  ;;  %s482_s26 = int_to_ptr.vmem [resolvable:$false] %s481_s26 }
  0x65   : > { %vm215_vm3 = vmor %vm776_vm15, %vm214_vm2  ;;  %s483_s5 = scalar_lea.vmem %s482_s26, 512  ;;  %p484_p2 = scmp.lt.s32.totalorder %s790_s21, %s482_s26 }
  0x66   : > { %vm224_vm4 = vmor %vm193_vm12, %vm215_vm3  ;;  %p480_p5 = pneg %p479_p3  ;;  %p485_p4 = scmp.lt.s32.totalorder %s483_s5, %s477_s8 }
  0x67   : > { %v226_v20 = vsel %vm224_vm4, 0.0, %v216_v18  ;;  %vm194_vm6 = vmor %vm762_vm8, %vm192_vm1 }
  0x68   : > { %228 = vst [vmem:[%s158_s12] sm:$0xff] %v226_v20  ;;  %vm225_vm7 = vmor %vm194_vm6, %vm215_vm3  ;;  %p486_p6 = por %p485_p4, %p484_p2 }
  0x69   : > { %v227_v21 = vsel %vm225_vm7, 0.0, %v217_v19 }
  0x6a   : > { %229 = vst [vmem:[%s158_s12 + $0x8] sm:$0xff] %v227_v21  ;;  %p487_p9 = pnand %p486_p6, %p480_p5 }
  0x6c   : > { %490 = shalt.err (!%p487_p9)
}
  0x6d   : > { %s491_s13 = scalar_lea.hbm %s798_s27, 256  ;;  %s495_s25 = scalar_lea.hbm %s854_s2, 1024 }
  0x6e   : > { %p492_p8 = scmp.ne.s32.totalorder %s798_s27, %s491_s13  ;;  %p496_p7 = scmp.lt.u32.totalorder %s798_s27, %s854_s2 }
  0x6f   : > { %p497_p10 = scmp.lt.u32.totalorder %s495_s25, %s491_s13  ;;  %p499_p13 = scmp.lt.u32.totalorder %s491_s13, %s798_s27 }
  0x70   : > { %p493_p11 = pnand %p492_p8, %p873_p0 }
  0x71   : > { %p498_p1 = por %p497_p10, %p496_p7 }
  0x72   : > { %p494_p12 = pneg %p493_p11 }
  0x73   : > { %p500_p3 = por %p499_p13, %p498_p1 }
  0x75   : > { %p501_p5 = pnand %p500_p3, %p494_p12 }
  0x77   : > { %504 = shalt.err (!%p501_p5)
}
  0x78   : > { %s585_s10 = smov 128   ;;  %s586_s12 = smov 256  }
  0x79   : > { %s587_s30 = smov 8  }
  0x7a   : > { %352 = dma.vmem_to_hbm [thread:$0]  (%p873_p0), %s790_s21, 256, %s798_s27, %s231_s28, %s585_s10, %s586_s12, %s587_s30  }
  0x7b PF: > { %p363_p2 = scmp.ge.s32.totalorder %s577_s20, 2  ;;  %s260_s1 = sand.u32 1, %s549_s14  }
  0x7c   : > { %p874_p4 = scmp.ne.s32.totalorder %s861_s4, 0  ;;  %s261_s16 = scalar_lea.sflag [#allocation6], %s260_s1 }
  0x7e   : > { %p359_p6 = pnand %p363_p2, %p874_p4 }
  0x80   : > { %544 = dma.done.wait (!%p359_p6), %s261_s16, 256  }
  0x81   : > { %546 = vsyncadd (!%p359_p6), %s261_s16, 4294967040  ;;  %s24_s20 = sadd.s32 1, %s577_s20   ;;  %s875_s14 = smov %s553_s0 }
  0x82   : > { %p21_p9 = scmp.ge.s32.totalorder %s24_s20, 6   ;;  %s876_s0 = smov %s557_s15 }
  0x83   : > { %s877_s15 = smov %s684_s6  ;;  %s878_s16 = smov %s569_s18 }
  0x84   : > { %s879_s17 = smov %s573_s19  ;;  %s880_s18 = smov %s883_s23 }
  0x85   : > { %s881_s19 = smov %s887_s24  ;;  %23 = sbr.rel (!%p21_p9) target bundleno = 22 (0x16), region = 69 }
  0x8c   :  { %266 = vsyncpa [#allocation5], 1 }
  0x8d   :  { %268 = vsyncpa [#allocation5 + $0x1], 1 }
  0x8e   :  { %269 = vsyncpa [#allocation6], 1 }
  0x8f   :  { %271 = vsyncpa [#allocation6 + $0x1], 1 }

</bundles_post_ra>
